<compile_context>
chip_gen: v7x
topology: tpu7x:2x2x1
jax: 0.10.0
libtpu: 0.0.40
codegen_flags: <defaults>
</compile_context>

<pallas_src>
import functools

import jax
import jax.numpy as jnp
from jax.experimental import pallas as pl
from jax.experimental.pallas import tpu as pltpu

BN_EPS = 1e-5
LANE = 128


def _round_up(n, m):
    return ((n + m - 1) // m) * m


def mlp_kernel(x_ref, w1_ref, w2_ref, aux_ref, o_ref, *, hp, op):
    # aux_ref rows: 0 = gamma (width hp), 1 = beta (width hp), 2 = b2 (width op)
    # ---- Linear 1 (bias omitted: it cancels under train-mode BatchNorm) ----
    # bf16 x bf16 operands, f32 accumulation on the MXU.
    h = jnp.dot(x_ref[...], w1_ref[...], preferred_element_type=jnp.float32)

    # ---- BatchNorm1d (training-mode biased batch stats), folded affine ----
    mean = jnp.mean(h, axis=0, keepdims=True)
    hc = h - mean
    var = jnp.mean(hc * hc, axis=0, keepdims=True)
    gamma = aux_ref[0:1, :hp]
    beta = aux_ref[1:2, :hp]
    b2 = aux_ref[2:3, :op]
    scale = gamma * jax.lax.rsqrt(var + BN_EPS)   # (1, hp) f32, rsqrt on EUP
    shift = beta - mean * scale                   # (1, hp) f32

    # ---- fused scale/shift + ReLU, cast to bf16 for the second MXU pass ----
    h_act = jnp.maximum(h * scale + shift, 0.0).astype(jnp.bfloat16)

    # ---- Linear 2: (B, hp) @ (hp, op) + (1, op) ----
    o_ref[...] = (
        jnp.dot(h_act, w2_ref[...], preferred_element_type=jnp.float32) + b2
    ).astype(o_ref.dtype)


def prepare_params(w1, b1, gamma, beta, w2, b2):
    """One-time parameter prep (hoisted out of the per-call path).

    Pads feature dims to lane-dense multiples of 128, casts matmul weights to
    bfloat16, and packs the three tiny per-feature vectors (gamma, beta, b2)
    into a single (3, W) f32 operand so the kernel issues one DMA instead of
    three.  b1 is dropped: a per-column bias added before train-mode
    BatchNorm cancels exactly.  Padded hidden columns stay exactly zero
    through BN ((0-0)*rsqrt(0+eps)+0 = 0) and multiply zero rows of w2, so
    real outputs are untouched.
    """
    del b1  # exactly cancelled by the train-mode batch-norm mean subtraction
    hidden = w1.shape[1]
    d_out = w2.shape[1]
    hp = _round_up(hidden, LANE)
    op = _round_up(d_out, LANE)
    w = max(hp, op)

    w1p = jnp.pad(w1, ((0, 0), (0, hp - hidden))).astype(jnp.bfloat16)
    w2p = jnp.pad(w2, ((0, hp - hidden), (0, op - d_out))).astype(jnp.bfloat16)
    aux = jnp.stack(
        [
            jnp.pad(gamma.reshape(-1), (0, w - hidden), constant_values=1.0),
            jnp.pad(beta.reshape(-1), (0, w - hidden)),
            jnp.pad(b2.reshape(-1), (0, w - d_out)),
        ],
        axis=0,
    ).astype(jnp.float32)  # (3, W) f32
    return w1p, w2p, aux


def make_mlp_forward(batch, input_dim, hidden_dim, output_dim):
    """Builds a jitted forward(x, w1p, w2p, aux) -> (batch, output_dim) f32."""
    hp = _round_up(hidden_dim, LANE)
    op = _round_up(output_dim, LANE)
    w = max(hp, op)

    vmem = pl.BlockSpec(memory_space=pltpu.MemorySpace.VMEM)
    bytes_accessed = (
        batch * input_dim * 2    # x  (bf16)
        + input_dim * hp * 2     # w1 (bf16)
        + hp * op * 2            # w2 (bf16)
        + 3 * w * 4              # aux (f32)
        + batch * op * 4         # out (f32)
    )
    call = pl.pallas_call(
        functools.partial(mlp_kernel, hp=hp, op=op),
        out_shape=jax.ShapeDtypeStruct((batch, op), jnp.float32),
        in_specs=[vmem] * 4,
        out_specs=vmem,
        cost_estimate=pl.CostEstimate(
            flops=2 * batch * (input_dim * hp + hp * op),
            transcendentals=hp,           # one rsqrt per hidden column
            bytes_accessed=bytes_accessed,
        ),
    )

    @jax.jit
    def forward(x, w1p, w2p, aux):
        out_padded = call(x.astype(jnp.bfloat16), w1p, w2p, aux)
        return out_padded[:, :output_dim]

    return forward


def make_params(key, input_dim, hidden_dim, output_dim):
    """Deterministic synthetic parameters (PyTorch-style uniform fan-in init)."""
    k1, k2, k3, k4 = jax.random.split(key, 4)
    bound1 = 1.0 / jnp.sqrt(input_dim)
    bound2 = 1.0 / jnp.sqrt(hidden_dim)
    # Stored already transposed: (in_features, out_features)
    w1 = jax.random.uniform(k1, (input_dim, hidden_dim), jnp.float32, -bound1, bound1)
    b1 = jax.random.uniform(k2, (1, hidden_dim), jnp.float32, -bound1, bound1)
    # BatchNorm1d default init: weight = 1, bias = 0
    gamma = jnp.ones((1, hidden_dim), jnp.float32)
    beta = jnp.zeros((1, hidden_dim), jnp.float32)
    w2 = jax.random.uniform(k3, (hidden_dim, output_dim), jnp.float32, -bound2, bound2)
    b2 = jax.random.uniform(k4, (1, output_dim), jnp.float32, -bound2, bound2)
    return w1, b1, gamma, beta, w2, b2


if __name__ == "__main__":
    # Small shapes consistent with the module's forward (2D input to Linear/BN1d).
    B, INPUT_DIM, HIDDEN_DIM, OUTPUT_DIM = 8, 32, 64, 16

    key = jax.random.PRNGKey(0)
    kx, kp = jax.random.split(key)
    x = jax.random.normal(kx, (B, INPUT_DIM), jnp.float32)
    w1, b1, gamma, beta, w2, b2 = make_params(kp, INPUT_DIM, HIDDEN_DIM, OUTPUT_DIM)

    # One-time prep (padding / casting / packing), then the jitted hot path.
    w1p, w2p, aux = prepare_params(w1, b1, gamma, beta, w2, b2)
    forward = make_mlp_forward(B, INPUT_DIM, HIDDEN_DIM, OUTPUT_DIM)

    out = forward(x, w1p, w2p, aux)
    out = jax.block_until_ready(out)
    assert out.shape == (B, OUTPUT_DIM)

    # --- Check 1 (tight): reference mirroring the kernel's bf16 matmul
    # operands / f32 stats, so only reduce-order noise separates them.
    h = jnp.dot(x.astype(jnp.bfloat16), w1.astype(jnp.bfloat16),
                preferred_element_type=jnp.float32)
    mu = h.mean(axis=0, keepdims=True)
    hc = h - mu
    var = (hc * hc).mean(axis=0, keepdims=True)
    scale = gamma * jax.lax.rsqrt(var + BN_EPS)
    shift = beta - mu * scale
    h_act = jnp.maximum(h * scale + shift, 0.0).astype(jnp.bfloat16)
    ref_bf16 = jnp.dot(h_act, w2.astype(jnp.bfloat16),
                       preferred_element_type=jnp.float32) + b2
    assert jnp.allclose(out, ref_bf16, atol=5e-3, rtol=5e-3), "kernel mismatch"

    # --- Check 2 (loose): pure-f32 PyTorch-semantics reference (Linear with
    # bias -> BatchNorm1d train mode -> ReLU -> Linear). Only bf16 MXU-operand
    # rounding separates the two paths.
    hf = x @ w1 + b1
    muf = hf.mean(axis=0, keepdims=True)
    varf = ((hf - muf) ** 2).mean(axis=0, keepdims=True)
    ref_f32 = jnp.maximum((hf - muf) / jnp.sqrt(varf + BN_EPS) * gamma + beta,
                          0.0) @ w2 + b2
    assert jnp.allclose(out, ref_f32, atol=1e-1, rtol=1e-1), "semantics drift"

    print("KERNEL_OK")
</pallas_src>

<mosaic_0001>
module attributes {stable_mosaic.version = 11 : i64} {
  func.func @mlp_kernel(%arg0: memref<8x32xbf16, #tpu.memory_space<vmem>>, %arg1: memref<32x128xbf16, #tpu.memory_space<vmem>>, %arg2: memref<128x128xbf16, #tpu.memory_space<vmem>>, %arg3: memref<3x128xf32, #tpu.memory_space<vmem>>, %arg4: memref<8x128xf32, #tpu.memory_space<vmem>>) attributes {dimension_semantics = [], scalar_prefetch = 0 : i64, scratch_operands = 0 : i64, tpu.core_type = #tpu.core_type<tc>} {
    %c0 = arith.constant 0 : index
    %c0_0 = arith.constant 0 : index
    %0 = vector.load %arg0[%c0, %c0_0] : memref<8x32xbf16, #tpu.memory_space<vmem>>, vector<8x32xbf16>
    %c0_1 = arith.constant 0 : index
    %c0_2 = arith.constant 0 : index
    %1 = vector.load %arg1[%c0_1, %c0_2] : memref<32x128xbf16, #tpu.memory_space<vmem>>, vector<32x128xbf16>
    %cst = arith.constant dense<0.000000e+00> : vector<8x128xf32>
    %2 = tpu.matmul %0, %1, %cst {dimension_numbers = #tpu.dot_dimension_numbers<[1], [0], [0], [1], [0, 0, 1, 1], [], []>} : vector<8x32xbf16>, vector<32x128xbf16>, vector<8x128xf32> -> vector<8x128xf32>
    %cst_3 = arith.constant dense<0.000000e+00> : vector<128xf32>
    %3 = vector.multi_reduction <add>, %2, %cst_3 [0] : vector<8x128xf32> to vector<128xf32>
    %4 = vector.shape_cast %3 : vector<128xf32> to vector<1x128xf32>
    %cst_4 = arith.constant 8.000000e+00 : f32
    %5 = vector.broadcast %cst_4 : f32 to vector<1x128xf32>
    %6 = arith.divf %4, %5 : vector<1x128xf32>
    %7 = vector.broadcast %6 : vector<1x128xf32> to vector<8x128xf32>
    %8 = arith.subf %2, %7 : vector<8x128xf32>
    %9 = arith.mulf %8, %8 : vector<8x128xf32>
    %cst_5 = arith.constant dense<0.000000e+00> : vector<128xf32>
    %10 = vector.multi_reduction <add>, %9, %cst_5 [0] : vector<8x128xf32> to vector<128xf32>
    %11 = vector.shape_cast %10 : vector<128xf32> to vector<1x128xf32>
    %cst_6 = arith.constant 8.000000e+00 : f32
    %12 = vector.broadcast %cst_6 : f32 to vector<1x128xf32>
    %13 = arith.divf %11, %12 : vector<1x128xf32>
    %c0_7 = arith.constant 0 : index
    %c0_8 = arith.constant 0 : index
    %14 = vector.load %arg3[%c0_7, %c0_8] : memref<3x128xf32, #tpu.memory_space<vmem>>, vector<1x128xf32>
    %c1 = arith.constant 1 : index
    %c0_9 = arith.constant 0 : index
    %15 = vector.load %arg3[%c1, %c0_9] : memref<3x128xf32, #tpu.memory_space<vmem>>, vector<1x128xf32>
    %c2 = arith.constant 2 : index
    %c0_10 = arith.constant 0 : index
    %16 = vector.load %arg3[%c2, %c0_10] : memref<3x128xf32, #tpu.memory_space<vmem>>, vector<1x128xf32>
    %cst_11 = arith.constant 9.99999974E-6 : f32
    %17 = vector.broadcast %cst_11 : f32 to vector<1x128xf32>
    %18 = arith.addf %13, %17 : vector<1x128xf32>
    %19 = math.rsqrt %18 : vector<1x128xf32>
    %20 = arith.mulf %14, %19 : vector<1x128xf32>
    %21 = arith.mulf %6, %20 : vector<1x128xf32>
    %22 = arith.subf %15, %21 : vector<1x128xf32>
    %23 = vector.broadcast %20 : vector<1x128xf32> to vector<8x128xf32>
    %24 = arith.mulf %2, %23 : vector<8x128xf32>
    %25 = vector.broadcast %22 : vector<1x128xf32> to vector<8x128xf32>
    %26 = arith.addf %24, %25 : vector<8x128xf32>
    %cst_12 = arith.constant 0.000000e+00 : f32
    %27 = vector.broadcast %cst_12 : f32 to vector<8x128xf32>
    %28 = arith.maximumf %26, %27 : vector<8x128xf32>
    %29 = arith.truncf %28 : vector<8x128xf32> to vector<8x128xbf16>
    %c0_13 = arith.constant 0 : index
    %c0_14 = arith.constant 0 : index
    %30 = vector.load %arg2[%c0_13, %c0_14] : memref<128x128xbf16, #tpu.memory_space<vmem>>, vector<128x128xbf16>
    %cst_15 = arith.constant dense<0.000000e+00> : vector<8x128xf32>
    %31 = tpu.matmul %29, %30, %cst_15 {dimension_numbers = #tpu.dot_dimension_numbers<[1], [0], [0], [1], [0, 0, 1, 1], [], []>} : vector<8x128xbf16>, vector<128x128xbf16>, vector<8x128xf32> -> vector<8x128xf32>
    %32 = vector.broadcast %16 : vector<1x128xf32> to vector<8x128xf32>
    %33 = arith.addf %31, %32 : vector<8x128xf32>
    %c0_16 = arith.constant 0 : index
    %c0_17 = arith.constant 0 : index
    %34 = vector.load %arg4[%c0_16, %c0_17] : memref<8x128xf32, #tpu.memory_space<vmem>>, vector<8x128xf32>
    tpu.vector_store %arg4[%c0_16, %c0_17], %33 {strides = array<i32>} : memref<8x128xf32, #tpu.memory_space<vmem>>, vector<8x128xf32>,
    return
  }
}

</mosaic_0001>

<bundles_post_ra>
// kernel: forward.1
= control target key start
LH: loop header
LB: loop body
LE: loop exit
PB: predicated region body
PF: predicated region fallthrough
CT: control target
= control target key end

     0   :  { %9 = vsyncpa [#allocation3], 0  ;;  %s493_s0 = inlined_call_operand.vmem [shape: bf16[8,32], index: 0, kind: input, shape index: {}]   ;;  %s494_s1 = inlined_call_operand.hbm [shape: bf16[32,128], index: 1, kind: input, shape index: {}]   ;;  %s495_s2 = inlined_call_operand.hbm [shape: bf16[128,128], index: 2, kind: input, shape index: {}]   ;;  %s496_s3 = inlined_call_operand.vmem [shape: f32[3,128], index: 3, kind: input, shape index: {}]   ;;  %s497_s4 = inlined_call_operand.hbm [shape: f32[8,128], index: 4, kind: output, shape index: {}]  }
   0x1   :  { %10 = vsyncpa [#allocation6], 0 }
   0x2   :  { %11 = vsyncpa [#allocation4], 0  ;;  %s413_s15 = smov [#allocation2]   ;;  %s341_s19 = scalar_lea.hbm %s494_s1, 256 }
   0x3   :  { %s19_s16 = sshll.u32 %s413_s15, 4  ;;  %p342_p0 = scmp.ne.s32.totalorder %s494_s1, %s341_s19  ;;  %s20_s16 = int_to_ptr.vmem [resolvable:$true] %s19_s16 }
   0x4   :  { %p345_p1 = scmp.lt.u32.totalorder %s341_s19, %s494_s1 }
   0x6   :  { %p347_p2 = pnand %p345_p1, %p342_p0 }
   0x8   :  { %350 = shalt.err (!%p347_p2)
}
   0x9   :  { %s351_s24 = scalar_lea.vmem %s20_s16, 256  ;;  %p356_p4 = scmp.lt.s32.totalorder %s20_s16, %s20_s16 }
   0xa   :  { %p352_p3 = scmp.ne.s32.totalorder %s20_s16, %s351_s24  ;;  %p357_p5 = scmp.lt.s32.totalorder %s351_s24, %s351_s24 }
   0xc   :  { %p358_p6 = por %p357_p5, %p356_p4 }
   0xe   :  { %p359_p7 = pnand %p358_p6, %p352_p3 }
  0x10   :  { %362 = shalt.err (!%p359_p7)
}
  0x11   :  { %s414_s25 = smov 64   ;;  %s415_s26 = smov 4  }
  0x12   :  { %25 = dma.hbm_to_vmem [thread:$0]  %s494_s1, 256, %s20_s16, [#allocation3], %s414_s25, %s414_s25, %s415_s26  }
  0x13   :  { %s416_s29 = smov [#allocation5]   ;;  %s363_s7 = scalar_lea.hbm %s495_s2, 1024 }
  0x14   :  { %s31_s30 = sshll.u32 %s416_s29, 4  ;;  %p364_p8 = scmp.ne.s32.totalorder %s495_s2, %s363_s7  ;;  %s32_s30 = int_to_ptr.vmem [resolvable:$true] %s31_s30 }
  0x15   :  { %p367_p9 = scmp.lt.u32.totalorder %s363_s7, %s495_s2 }
  0x17   :  { %p369_p10 = pnand %p367_p9, %p364_p8 }
  0x19   :  { %372 = shalt.err (!%p369_p10)
}
  0x1a   :  { %s373_s12 = scalar_lea.vmem %s32_s30, 1024  ;;  %p378_p12 = scmp.lt.s32.totalorder %s32_s30, %s32_s30 }
  0x1b   :  { %p374_p11 = scmp.ne.s32.totalorder %s32_s30, %s373_s12  ;;  %p379_p13 = scmp.lt.s32.totalorder %s373_s12, %s373_s12 }
  0x1d   :  { %p380_p0 = por %p379_p13, %p378_p12 }
  0x1f   :  { %p381_p1 = pnand %p380_p0, %p374_p11 }
  0x21   :  { %384 = shalt.err (!%p381_p1)
}
  0x22   :  { %37 = dma.hbm_to_vmem [thread:$0]  %s495_s2, 1024, %s32_s30, [#allocation6], %s414_s25, %s414_s25, %s415_s26  }
  0x23   :  { %407 = dma.done.wait [#allocation3], 256  }
  0x24   :  { %408 = vsyncadd [#allocation3], 4294967040 }
  0x25   :  { %409 = dma.done.wait [#allocation6], 1024  }
  0x26   :  { %410 = vsyncadd [#allocation6], 4294966272  ;;  %v417_v0 = vmov 0.0   ;;  %vm418_vm0 = vmmov 0   ;;  %v329_v1 = vld [vmem:[#allocation2] sm:$0xff]   ;;  %v330_v2 = vld [vmem:[#allocation2 + $0x8] sm:$0xff]   ;;  %v133_v33 = vlaneseq }
  0x27   :  { %294 = vmatprep.subr.bf16.mxu0 %v417_v0  ;;  %298 = vmatprep.mubr.msk.bf16.mxu0 %vm418_vm0, %v417_v0  ;;  %vm64_vm1 = vcmask 261120   ;;  %v47_v3 = vld [vmem:[%s493_s0] sm:$0xf]  ;;  %v331_v4 = vld [vmem:[#allocation5] sm:$0xff]   ;;  %v333_v6 = vld [vmem:[#allocation5 + $0x10] sm:$0xff]   ;;  %s419_s20 = smov [#allocation7]  }
  0x28   :  { %302 = vmatprep.subr.bf16.mxu1 %v417_v0  ;;  %318 = vmatprep.mubr.msk.bf16.mxu1 %vm418_vm0, %v417_v0  ;;  %v332_v5 = vld [vmem:[#allocation5 + $0x8] sm:$0xff]   ;;  %v334_v7 = vld [vmem:[#allocation5 + $0x18] sm:$0xff]   ;;  %v335_v8 = vld [vmem:[#allocation5 + $0x20] sm:$0xff]   ;;  %v134_v34 = vshrl.u32 %v133_v33, 7  ;;  %s260_s21 = sshll.u32 %s419_s20, 4  ;;  %s261_s21 = int_to_ptr.vmem [resolvable:$true] %s260_s21 }
  0x29   :  { %295 = vmatpush3.bf16.msra.mxu0 %v329_v1  ;;  %303 = vmatpush3.bf16.msra.mxu1 %v331_v4  ;;  %v336_v9 = vld [vmem:[#allocation5 + $0x28] sm:$0xff]   ;;  %v337_v10 = vld [vmem:[#allocation5 + $0x30] sm:$0xff]   ;;  %v338_v11 = vld [vmem:[#allocation5 + $0x38] sm:$0xff]   ;;  %s385_s22 = scalar_lea.vmem %s261_s21, 128  ;;  %p390_p3 = scmp.lt.s32.totalorder %s261_s21, %s261_s21 }
  0x2a   :  { %296 = vmatprep.subr.bf16.mxu0 %v417_v0  ;;  %304 = vmatprep.subr.bf16.mxu1 %v417_v0  ;;  %v125_v35 = vld [vmem:[%s496_s3] sm:$0x1]  ;;  %v135_v36 = vsub.s32 0, %v134_v34  ;;  %v126_v39 = vld [vmem:[%s496_s3 + $0x1] sm:$0x1]  ;;  %p386_p2 = scmp.ne.s32.totalorder %s261_s21, %s385_s22  ;;  %p391_p4 = scmp.lt.s32.totalorder %s385_s22, %s385_s22 }
  0x2b   :  { %v273_v48 = vld [vmem:[%s496_s3 + $0x2] ss:$0 sm:$0xff] }
  0x2c   :  { %p392_p5 = por %p391_p4, %p390_p3 }
  0x2d   :  { %297 = vmatpush3.bf16.msra.mxu0 %v330_v2  ;;  %305 = vmatpush3.bf16.msra.mxu1 %v332_v5 }
  0x2e   :  { %306 = vmatprep.subr.bf16.mxu1 %v417_v0  ;;  %p393_p6 = pnand %p392_p5, %p386_p2 }
  0x30   :  { %299 = vmatmul.mubr.msk.bf16.vlgmr.msra.gmra.mrb[0].mxu0 %vm64_vm1, %v47_v3 }
  0x31   :  { %307 = vmatpush3.bf16.msra.mxu1 %v333_v6 }
  0x32   :  { %308 = vmatprep.subr.bf16.mxu1 %v417_v0 }
  0x35   :  { %309 = vmatpush3.bf16.msra.mxu1 %v334_v7 }
  0x36   :  { %310 = vmatprep.subr.bf16.mxu1 %v417_v0 }
  0x39   :  { %311 = vmatpush3.bf16.msra.mxu1 %v335_v8 }
  0x3a   :  { %312 = vmatprep.subr.bf16.mxu1 %v417_v0 }
  0x3d   :  { %313 = vmatpush3.bf16.msra.mxu1 %v336_v9 }
  0x3e   :  { %314 = vmatprep.subr.bf16.mxu1 %v417_v0 }
  0x41   :  { %315 = vmatpush3.bf16.msra.mxu1 %v337_v10 }
  0x42   :  { %316 = vmatprep.subr.bf16.mxu1 %v417_v0 }
  0x45   :  { %317 = vmatpush3.bf16.msra.mxu1 %v338_v11 }
 0x103   :  { %v102_v12 = vpop.f32.mrb[0].mxu0 }
 0x104   :  { %v108_v13 = vrot.slane %v102_v12, 4  ;;  %v300_v14 = vpop.f32.mrb[1].mxu0 }
 0x105   :  { %v105_v15 = vpop.f32.mrb[2].mxu0 }
 0x106   :  { %v109_v16 = vadd.f32 %v108_v13, %v102_v12  ;;  %v301_v17 = vpop.f32.mrb[3].mxu0 }
 0x108   :  { %v110_v18 = vrot.slane %v109_v16, 2 }
 0x10a   :  { %v111_v19 = vadd.f32 %v110_v18, %v109_v16 }
 0x10c   :  { %v112_v20 = vrot.slane %v111_v19, 1 }
 0x10e   :  { %v113_v21 = vadd.f32 %v112_v20, %v111_v19 }
 0x110   :  { %v115_v22 = vmul.f32 0.125, %v113_v21 }
 0x112   :  { %v116_v23 = vsub.f32 %v102_v12, %v115_v22 }
 0x114   :  { %v117_v24 = vmul.f32 %v116_v23, %v116_v23 }
 0x116   :  { %v118_v25 = vrot.slane %v117_v24, 4 }
 0x118   :  { %v119_v26 = vadd.f32 %v118_v25, %v117_v24 }
 0x11a   :  { %v120_v27 = vrot.slane %v119_v26, 2 }
 0x11c   :  { %v121_v28 = vadd.f32 %v120_v27, %v119_v26 }
 0x11e   :  { %v122_v29 = vrot.slane %v121_v28, 1 }
 0x120   :  { %v123_v30 = vadd.f32 %v122_v29, %v121_v28 }
 0x122   :  { %v124_v31 = vmul.f32 0.125, %v123_v30 }
 0x124   :  { %v128_v32 = vadd.f32 1e-05, %v124_v31 }
 0x126   :  { %339 = vrsqrt.f32 %v128_v32 }
 0x130   :  { %v340_v37 = vpop.eup %339 }
 0x131   :  { %v130_v38 = vmul.f32 %v340_v37, %v125_v35 }
 0x133   :  { %v131_v40 = vmul.f32 %v130_v38, %v115_v22  ;;  %v136_v41 = vrot.slane %v130_v38, %v135_v36 }
 0x135   :  { %v132_v42 = vsub.f32 %v126_v39, %v131_v40  ;;  %v137_v43 = vmul.f32 %v136_v41, %v102_v12 }
 0x137   :  { %v141_v44 = vrot.slane %v132_v42, %v135_v36 }
 0x139   :  { %v142_v45 = vadd.f32 %v141_v44, %v137_v43 }
 0x13b   :  { %v143_v46 = vmax.f32 %v142_v45, 0.0 }
 0x13d   :  { %v144_v47 = vpack.c.bf16 %v143_v46, %v143_v46 }
 0x13f   :  { %319 = vmatmul.mubr.bf16.vlgmr.msra.gmra.mrb[0].mxu1 %v144_v47 }
 0x212   :  { %v247_v49 = vpop.f32.mrb[0].mxu1 }
 0x213   :  { %v248_v50 = vadd.f32 %v273_v48, %v247_v49  ;;  %v320_v51 = vpop.f32.mrb[1].mxu1 }
 0x214   :  { %v250_v52 = vpop.f32.mrb[2].mxu1 }
 0x215   :  { %253 = vst [vmem:[#allocation7] sm:$0xff] %v248_v50  ;;  %v321_v53 = vpop.f32.mrb[3].mxu1 }
 0x216   :  { %396 = shalt.err (!%p393_p6)
}
 0x217   :  { %s397_s3 = scalar_lea.hbm %s497_s4, 128 }
 0x218   :  { %p398_p7 = scmp.ne.s32.totalorder %s497_s4, %s397_s3  ;;  %p401_p8 = scmp.lt.u32.totalorder %s397_s3, %s497_s4 }
 0x21a   :  { %p403_p9 = pnand %p401_p8, %p398_p7 }
 0x21c   :  { %406 = shalt.err (!%p403_p9)
}
 0x21d   :  { %263 = dma.vmem_to_hbm [thread:$0]  %s261_s21, 128, %s497_s4, [#allocation4]  }
 0x21e   :  { %411 = dma.done.wait [#allocation4], 128  }
 0x21f   :  { %412 = vsyncadd [#allocation4], 4294967168 }
 0x220   :  { %267 = vsyncpa [#allocation3], 1 }
 0x221   :  { %268 = vsyncpa [#allocation6], 1 }
 0x222   :  { %269 = vsyncpa [#allocation4], 1 }

</bundles_post_ra>
